<compile_context>
chip_gen: v7x
topology: tpu7x:2x2x1
jax: 0.10.0
libtpu: 0.0.40
codegen_flags: <defaults>
</compile_context>

<pallas_src>
import jax
import jax.numpy as jnp
from jax import lax
from jax.experimental import pallas as pl
from jax.experimental.pallas import tpu as pltpu

GIN_EPS = 1.0        # GINEConv(..., eps=True) => initial eps == float(True) == 1.0
BN_EPS = 1e-5        # nn.BatchNorm1d default eps
LEAKY_SLOPE = 0.01   # F.leaky_relu default negative_slope
VMEM_LIMIT = 48 * 1024 * 1024


def _round_up(v, m):
    return ((v + m - 1) // m) * m


def matching_network_forward(x, edge_index, edge_x, batch, num_graphs, params,
                             *, tile_n=32, tile_e=128, tile_k=128):
    f32, bf16, i32 = jnp.float32, jnp.bfloat16, jnp.int32
    n, f_in = x.shape
    e_num, e_dim = edge_x.shape
    h_dim = params["w1_t"].shape[1]
    p_dim = params["wp_t"].shape[1]
    o_dim = params["wm_t"].shape[1]

    # ---- padded (lane-dense) dimensions --------------------------------------
    F_PAD = _round_up(f_in, 128)
    ED_PAD = _round_up(e_dim, 128)
    H_PAD = _round_up(h_dim, 128)
    P_PAD = _round_up(p_dim, 128)
    O_PAD = _round_up(o_dim, 128)
    G_PAD = _round_up(num_graphs, 8)

    EC = 128                                   # edge chunk for in-kernel scatter-add
    assert tile_n % 16 == 0 and EC % tile_e == 0 and tile_k % 128 == 0
    N_PAD = _round_up(n, tile_n)
    E_PAD = _round_up(e_num, EC)               # multiple of EC and of tile_e
    TK = min(tile_k, H_PAD)
    while H_PAD % TK:                          # largest 128-multiple divisor of H_PAD
        TK -= 128
    n_e_tiles = E_PAD // tile_e
    n_n_tiles = N_PAD // tile_n
    n_k_tiles = H_PAD // TK
    n_e_chunks = E_PAD // EC

    # ---- host-side padding / dtype prep --------------------------------------
    def pad2(a, r, c, dtype=None):
        out = jnp.pad(a, ((0, r - a.shape[0]), (0, c - a.shape[1])))
        return out.astype(dtype) if dtype is not None else out

    x_p = pad2(x, N_PAD, F_PAD, bf16)
    ex_p = pad2(edge_x, E_PAD, ED_PAD, bf16)

    # index vectors: padded edges scatter to sentinel node N_PAD (never matched),
    # padded nodes pool into sentinel graph G_PAD (never matched).
    src_col = jnp.pad(edge_index[0].astype(i32), (0, E_PAD - e_num))[:, None]             # [E_PAD, 1]
    dst_row = jnp.pad(edge_index[1].astype(i32), (0, E_PAD - e_num),
                      constant_values=N_PAD)[None, :]                                      # [1, E_PAD]
    bat_col = jnp.pad(batch.astype(i32), (0, N_PAD - n), constant_values=G_PAD)[:, None]   # [N_PAD, 1]

    we = pad2(params["we_t"], ED_PAD, F_PAD, bf16)
    be = pad2(params["be"], 1, F_PAD)
    w1 = pad2(params["w1_t"], F_PAD, H_PAD, bf16)
    b1 = pad2(params["b1"], 1, H_PAD)
    w2 = pad2(params["w2_t"], H_PAD, H_PAD, bf16)
    b2 = pad2(params["b2"], 1, H_PAD)
    # fold BatchNorm1d (inference) into scale/shift
    bn_scale = params["gamma"] * lax.rsqrt(params["var"] + BN_EPS)
    bn_shift = params["beta"] - params["mu"] * bn_scale
    bns = pad2(bn_scale, 1, H_PAD)
    bnb = pad2(bn_shift, 1, H_PAD)
    wp = pad2(params["wp_t"], H_PAD, P_PAD, bf16)
    bp = pad2(params["bp"], 1, P_PAD)
    wm = pad2(params["wm_t"], P_PAD, O_PAD, bf16)
    bm = pad2(params["bm"], 1, O_PAD)

    # ======================= kernel 1: edge messages ==========================
    def msg_kernel(ex_ref, src_ref, x_ref, we_ref, be_ref, msg_ref):
        # edge-attr projection
        e_emb = jnp.dot(ex_ref[...], we_ref[...], preferred_element_type=f32) + be_ref[...]
        # gather x_j via in-kernel one-hot (exact in bf16, MXU-friendly)
        # TODO(synk): replace with a true index gather (jnp.take / DMA gather) for very large N.
        node_ids = lax.broadcasted_iota(jnp.int32, (tile_e, N_PAD), 1)
        onehot = jnp.where(src_ref[...] == node_ids, 1.0, 0.0).astype(bf16)   # [tile_e, N_PAD]
        x_src = jnp.dot(onehot, x_ref[...], preferred_element_type=f32)       # [tile_e, F_PAD]
        msg_ref[...] = jnp.maximum(x_src + e_emb, 0.0).astype(bf16)

    msg = pl.pallas_call(
        msg_kernel,
        out_shape=jax.ShapeDtypeStruct((E_PAD, F_PAD), bf16),
        grid_spec=pltpu.PrefetchScalarGridSpec(
            num_scalar_prefetch=0,
            grid=(n_e_tiles,),
            in_specs=[
                pl.BlockSpec((tile_e, ED_PAD), lambda t: (t, 0)),   # edge_x tile
                pl.BlockSpec((tile_e, 1), lambda t: (t, 0)),        # src ids tile
                pl.BlockSpec((N_PAD, F_PAD), lambda t: (0, 0)),     # x (resident)
                pl.BlockSpec((ED_PAD, F_PAD), lambda t: (0, 0)),    # We
                pl.BlockSpec((1, F_PAD), lambda t: (0, 0)),         # be
            ],
            out_specs=pl.BlockSpec((tile_e, F_PAD), lambda t: (t, 0)),
        ),
        compiler_params=pltpu.CompilerParams(
            dimension_semantics=("parallel",),
            vmem_limit_bytes=VMEM_LIMIT,
        ),
    )(ex_p, src_col, x_p, we, be)

    # ================ kernel 2: node MLP + BN + global_add_pool ================
    def node_pool_kernel(x_ref, dst_ref, bat_ref, msg_ref, w1_ref, b1_ref,
                         w2_ref, b2_ref, bns_ref, bnb_ref,
                         pooled_ref, h1_s, acc_s):
        i = pl.program_id(0)            # node tile
        k = pl.program_id(1)            # K tile of the W2 reduction (last/fastest axis)

        @pl.when(jnp.logical_and(i == 0, k == 0))
        def _():
            pooled_ref[...] = jnp.zeros_like(pooled_ref)

        @pl.when(k == 0)
        def _():
            # scatter-add messages into this node tile, one 128-edge chunk at a time
            # TODO(synk): for very large E, pre-sort edges by dst on the host and use
            # scalar-prefetched per-tile edge ranges instead of scanning all chunks.
            node_ids = lax.broadcasted_iota(jnp.int32, (tile_n, EC), 0) + i * tile_n

            def edge_body(t, aggr):
                start = pl.multiple_of(t * EC, EC)
                d = dst_ref[:, pl.ds(start, EC)]                          # [1, EC]
                oh = jnp.where(node_ids == d, 1.0, 0.0).astype(bf16)      # [tile_n, EC]
                m = msg_ref[pl.ds(start, EC), :]                          # [EC, F_PAD] bf16
                return aggr + jnp.dot(oh, m, preferred_element_type=f32)

            aggr = lax.fori_loop(0, n_e_chunks, edge_body,
                                 jnp.zeros((tile_n, F_PAD), f32),
                                 unroll=(n_e_chunks <= 8))
            h = (1.0 + GIN_EPS) * x_ref[...].astype(f32) + aggr
            h1 = jnp.dot(h.astype(bf16), w1_ref[...],
                         preferred_element_type=f32) + b1_ref[...]
            h1_s[...] = jnp.maximum(h1, 0.0)                              # GINE nn hidden
            acc_s[...] = jnp.zeros_like(acc_s)

        # h2 accumulation over K tiles of W2
        kstart = pl.multiple_of(k * TK, TK)
        h1_blk = h1_s[:, pl.ds(kstart, TK)].astype(bf16)                  # [tile_n, TK]
        acc_s[...] += jnp.dot(h1_blk, w2_ref[...], preferred_element_type=f32)

        @pl.when(k == n_k_tiles - 1)
        def _():
            qz = jnp.maximum(acc_s[...] + b2_ref[...], 0.0)               # F.relu
            qz = qz * bns_ref[...] + bnb_ref[...]                         # folded BatchNorm
            # global_add_pool: masked f32 sums per graph (G is tiny)
            bat = bat_ref[...]                                            # [tile_n, 1] int32
            parts = [jnp.sum(jnp.where(bat == g, qz, 0.0), axis=0, keepdims=True)
                     for g in range(G_PAD)]
            pooled_ref[...] += jnp.concatenate(parts, axis=0)             # [G_PAD, H_PAD]

    pooled = pl.pallas_call(
        node_pool_kernel,
        out_shape=jax.ShapeDtypeStruct((G_PAD, H_PAD), f32),
        grid_spec=pltpu.PrefetchScalarGridSpec(
            num_scalar_prefetch=0,
            grid=(n_n_tiles, n_k_tiles),
            in_specs=[
                pl.BlockSpec((tile_n, F_PAD), lambda i, k: (i, 0)),   # x tile
                pl.BlockSpec((1, E_PAD), lambda i, k: (0, 0)),        # dst ids (resident)
                pl.BlockSpec((tile_n, 1), lambda i, k: (i, 0)),       # batch ids tile
                pl.BlockSpec((E_PAD, F_PAD), lambda i, k: (0, 0)),    # messages (resident)
                pl.BlockSpec((F_PAD, H_PAD), lambda i, k: (0, 0)),    # W1
                pl.BlockSpec((1, H_PAD), lambda i, k: (0, 0)),        # b1
                pl.BlockSpec((TK, H_PAD), lambda i, k: (k, 0)),       # W2 K-tile
                pl.BlockSpec((1, H_PAD), lambda i, k: (0, 0)),        # b2
                pl.BlockSpec((1, H_PAD), lambda i, k: (0, 0)),        # BN scale
                pl.BlockSpec((1, H_PAD), lambda i, k: (0, 0)),        # BN shift
            ],
            out_specs=pl.BlockSpec((G_PAD, H_PAD), lambda i, k: (0, 0)),
            scratch_shapes=[
                pltpu.VMEM((tile_n, H_PAD), f32),   # h1
                pltpu.VMEM((tile_n, H_PAD), f32),   # h2 accumulator
            ],
        ),
        compiler_params=pltpu.CompilerParams(
            # both axes accumulate into the resident pooled block -> "arbitrary"
            dimension_semantics=("arbitrary", "arbitrary"),
            vmem_limit_bytes=VMEM_LIMIT,
        ),
    )(x_p, dst_row, bat_col, msg, w1, b1, w2, b2, bns, bnb)

    # ===================== kernel 3: proj + matcher head =======================
    def head_kernel(pooled_ref, wp_ref, bp_ref, wm_ref, bm_ref, out_ref, q_acc):
        k = pl.program_id(0)

        @pl.when(k == 0)
        def _():
            q_acc[...] = jnp.zeros_like(q_acc)

        q_acc[...] += jnp.dot(pooled_ref[...].astype(bf16), wp_ref[...],
                              preferred_element_type=f32)

        @pl.when(k == pl.num_programs(0) - 1)
        def _():
            q = q_acc[...] + bp_ref[...]
            q = jnp.where(q > 0.0, q, LEAKY_SLOPE * q)                    # leaky_relu
            logits = jnp.dot(q.astype(bf16), wm_ref[...],
                             preferred_element_type=f32) + bm_ref[...]
            out_ref[...] = pl.reciprocal(1.0 + jnp.exp(-logits), approx=True)

    out_pad = pl.pallas_call(
        head_kernel,
        out_shape=jax.ShapeDtypeStruct((G_PAD, O_PAD), f32),
        grid_spec=pltpu.PrefetchScalarGridSpec(
            num_scalar_prefetch=0,
            grid=(n_k_tiles,),
            in_specs=[
                pl.BlockSpec((G_PAD, TK), lambda k: (0, k)),      # pooled K-tile
                pl.BlockSpec((TK, P_PAD), lambda k: (k, 0)),      # Wp K-tile
                pl.BlockSpec((1, P_PAD), lambda k: (0, 0)),       # bp
                pl.BlockSpec((P_PAD, O_PAD), lambda k: (0, 0)),   # Wm
                pl.BlockSpec((1, O_PAD), lambda k: (0, 0)),       # bm
            ],
            out_specs=pl.BlockSpec((G_PAD, O_PAD), lambda k: (0, 0)),
            scratch_shapes=[pltpu.VMEM((G_PAD, P_PAD), f32)],
        ),
        compiler_params=pltpu.CompilerParams(
            dimension_semantics=("arbitrary",),
            vmem_limit_bytes=VMEM_LIMIT,
        ),
    )(pooled, wp, bp, wm, bm)

    return out_pad[:num_graphs, :o_dim]


def reference_forward(x, edge_index, edge_x, batch, num_graphs, params):
    """Pure-JAX f32 reference with identical math (for correctness check)."""
    src = jax.nn.one_hot(edge_index[0], x.shape[0], dtype=jnp.float32)
    dst = jax.nn.one_hot(edge_index[1], x.shape[0], dtype=jnp.float32).T
    pool = jax.nn.one_hot(batch, num_graphs, dtype=jnp.float32).T
    e = edge_x @ params["we_t"] + params["be"]
    msg = jnp.maximum(src @ x + e, 0.0)
    h = (1.0 + GIN_EPS) * x + dst @ msg
    h1 = jnp.maximum(h @ params["w1_t"] + params["b1"], 0.0)
    qz = jnp.maximum(h1 @ params["w2_t"] + params["b2"], 0.0)
    qz = params["gamma"] * (qz - params["mu"]) * lax.rsqrt(params["var"] + BN_EPS) + params["beta"]
    pooled = pool @ qz
    q = pooled @ params["wp_t"] + params["bp"]
    q = jnp.where(q > 0.0, q, LEAKY_SLOPE * q)
    logits = q @ params["wm_t"] + params["bm"]
    return jax.nn.sigmoid(logits)


def init_params(key, input_dim, edge_dim, q_hid_dim, q_num_layers, q_num, project_dim, output_dim):
    ks = jax.random.split(key, 8)
    s = 0.05
    f32 = jnp.float32
    return {
        # GINEConv edge linear: edge_dim -> input_dim (stored transposed for x @ W)
        "we_t": s * jax.random.normal(ks[0], (edge_dim, input_dim), f32),
        "be": jnp.zeros((1, input_dim), f32),
        # GINE nn MLP
        "w1_t": s * jax.random.normal(ks[1], (input_dim, q_hid_dim), f32),
        "b1": s * jax.random.normal(ks[2], (1, q_hid_dim), f32),
        "w2_t": s * jax.random.normal(ks[3], (q_hid_dim, q_hid_dim), f32),
        "b2": s * jax.random.normal(ks[4], (1, q_hid_dim), f32),
        # BatchNorm1d (fresh module, eval mode)
        "gamma": jnp.ones((1, q_hid_dim), f32),
        "beta": jnp.zeros((1, q_hid_dim), f32),
        "mu": jnp.zeros((1, q_hid_dim), f32),
        "var": jnp.ones((1, q_hid_dim), f32),
        # proj: Linear(q_hid_dim * q_num_layers, project_dim)
        "wp_t": s * jax.random.normal(ks[5], (q_hid_dim * q_num_layers, project_dim), f32),
        "bp": jnp.zeros((1, project_dim), f32),
        # matcher: Linear(project_dim * q_num, output_dim)
        "wm_t": s * jax.random.normal(ks[6], (project_dim * q_num, output_dim), f32),
        "bm": jnp.zeros((1, output_dim), f32),
    }


if __name__ == "__main__":
    # Small, forward-consistent shapes (original: input_dim=28, q_hid_dim=3000,
    # project_dim=3750, edge_dim=20 — scaled down here; q_hid picked so the
    # K-tiled reduction actually runs >1 step).
    INPUT_DIM = 16
    EDGE_DIM = 8
    Q_HID_DIM = 256
    PROJECT_DIM = 128
    OUTPUT_DIM = 8
    Q_NUM = 1
    Q_NUM_LAYERS = 1
    NUM_NODES = 32
    NUM_EDGES = 64
    NUM_GRAPHS = 2

    key = jax.random.PRNGKey(0)
    k_x, k_ex, k_src, k_dst, k_p = jax.random.split(key, 5)

    x = jax.random.normal(k_x, (NUM_NODES, INPUT_DIM), jnp.float32)
    edge_x = jax.random.normal(k_ex, (NUM_EDGES, EDGE_DIM), jnp.float32)
    edge_index = jnp.stack([
        jax.random.randint(k_src, (NUM_EDGES,), 0, NUM_NODES),
        jax.random.randint(k_dst, (NUM_EDGES,), 0, NUM_NODES),
    ])
    # batch assignment: nodes split evenly between the NUM_GRAPHS graphs
    batch = jnp.repeat(jnp.arange(NUM_GRAPHS, dtype=jnp.int32), NUM_NODES // NUM_GRAPHS)

    params = init_params(k_p, INPUT_DIM, EDGE_DIM, Q_HID_DIM, Q_NUM_LAYERS,
                         Q_NUM, PROJECT_DIM, OUTPUT_DIM)

    out = matching_network_forward(x, edge_index, edge_x, batch, NUM_GRAPHS, params)
    out = jax.block_until_ready(out)

    ref = reference_forward(x, edge_index, edge_x, batch, NUM_GRAPHS, params)
    assert out.shape == (NUM_GRAPHS, OUTPUT_DIM)
    # bf16 MXU operands + approx reciprocal -> compare against the f32 reference
    # with a loosened (but still structurally meaningful) tolerance.
    assert jnp.allclose(out, ref, atol=5e-2, rtol=0.0), float(jnp.max(jnp.abs(out - ref)))

    print("KERNEL_OK")
</pallas_src>

<mosaic_0001>
module attributes {stable_mosaic.version = 11 : i64} {
  func.func @msg_kernel(%arg0: i32, %arg1: memref<128x128xbf16, #tpu.memory_space<vmem>>, %arg2: memref<128x1xi32, #tpu.memory_space<vmem>>, %arg3: memref<32x128xbf16, #tpu.memory_space<vmem>>, %arg4: memref<128x128xbf16, #tpu.memory_space<vmem>>, %arg5: memref<1x128xf32, #tpu.memory_space<vmem>>, %arg6: memref<128x128xbf16, #tpu.memory_space<vmem>>) attributes {dimension_semantics = [#tpu.dimension_semantics<parallel>], iteration_bounds = array<i64: 1>, scalar_prefetch = 0 : i64, scratch_operands = 0 : i64, tpu.core_type = #tpu.core_type<tc>, window_params = [{transform_indices = @transform_0, window_bounds = array<i64: 128, 128>}, {transform_indices = @transform_1, window_bounds = array<i64: 128, 1>}, {pipeline_mode = #tpu.pipeline_mode<synchronous>, transform_indices = @transform_2, window_bounds = array<i64: 32, 128>}, {pipeline_mode = #tpu.pipeline_mode<synchronous>, transform_indices = @transform_3, window_bounds = array<i64: 128, 128>}, {pipeline_mode = #tpu.pipeline_mode<synchronous>, transform_indices = @transform_4, window_bounds = array<i64: 1, 128>}, {transform_indices = @transform_5, window_bounds = array<i64: 128, 128>}]} {
    %c0 = arith.constant 0 : index
    %c0_0 = arith.constant 0 : index
    %0 = vector.load %arg1[%c0, %c0_0] : memref<128x128xbf16, #tpu.memory_space<vmem>>, vector<128x128xbf16>
    %c0_1 = arith.constant 0 : index
    %c0_2 = arith.constant 0 : index
    %1 = vector.load %arg4[%c0_1, %c0_2] : memref<128x128xbf16, #tpu.memory_space<vmem>>, vector<128x128xbf16>
    %cst = arith.constant dense<0.000000e+00> : vector<128x128xf32>
    %2 = tpu.matmul %0, %1, %cst {dimension_numbers = #tpu.dot_dimension_numbers<[1], [0], [0], [1], [0, 0, 1, 1], [], []>} : vector<128x128xbf16>, vector<128x128xbf16>, vector<128x128xf32> -> vector<128x128xf32>
    %c0_3 = arith.constant 0 : index
    %c0_4 = arith.constant 0 : index
    %3 = vector.load %arg5[%c0_3, %c0_4] : memref<1x128xf32, #tpu.memory_space<vmem>>, vector<1x128xf32>
    %4 = vector.broadcast %3 : vector<1x128xf32> to vector<128x128xf32>
    %5 = arith.addf %2, %4 : vector<128x128xf32>
    %6 = tpu.iota {dimensions = array<i32: 1>} : vector<128x32xi32>
    %c0_5 = arith.constant 0 : index
    %c0_6 = arith.constant 0 : index
    %7 = vector.load %arg2[%c0_5, %c0_6] : memref<128x1xi32, #tpu.memory_space<vmem>>, vector<128x1xi32>
    %8 = vector.broadcast %7 : vector<128x1xi32> to vector<128x32xi32>
    %9 = arith.cmpi eq, %8, %6 : vector<128x32xi32>
    %cst_7 = arith.constant 1.000000e+00 : f32
    %cst_8 = arith.constant 0.000000e+00 : f32
    %10 = vector.broadcast %cst_7 : f32 to vector<128x32xf32>
    %11 = vector.broadcast %cst_8 : f32 to vector<128x32xf32>
    %12 = arith.select %9, %10, %11 : vector<128x32xi1>, vector<128x32xf32>
    %13 = arith.truncf %12 : vector<128x32xf32> to vector<128x32xbf16>
    %c0_9 = arith.constant 0 : index
    %c0_10 = arith.constant 0 : index
    %14 = vector.load %arg3[%c0_9, %c0_10] : memref<32x128xbf16, #tpu.memory_space<vmem>>, vector<32x128xbf16>
    %cst_11 = arith.constant dense<0.000000e+00> : vector<128x128xf32>
    %15 = tpu.matmul %13, %14, %cst_11 {dimension_numbers = #tpu.dot_dimension_numbers<[1], [0], [0], [1], [0, 0, 1, 1], [], []>} : vector<128x32xbf16>, vector<32x128xbf16>, vector<128x128xf32> -> vector<128x128xf32>
    %16 = arith.addf %15, %5 : vector<128x128xf32>
    %cst_12 = arith.constant 0.000000e+00 : f32
    %17 = vector.broadcast %cst_12 : f32 to vector<128x128xf32>
    %18 = arith.maximumf %16, %17 : vector<128x128xf32>
    %19 = arith.truncf %18 : vector<128x128xf32> to vector<128x128xbf16>
    %c0_13 = arith.constant 0 : index
    %c0_14 = arith.constant 0 : index
    %20 = vector.load %arg6[%c0_13, %c0_14] : memref<128x128xbf16, #tpu.memory_space<vmem>>, vector<128x128xbf16>
    tpu.vector_store %arg6[%c0_13, %c0_14], %19 {strides = array<i32>} : memref<128x128xbf16, #tpu.memory_space<vmem>>, vector<128x128xbf16>,
    return
  }
  func.func @transform_0(%arg0: i32) -> (i32, i32) {
    %c0_i32 = arith.constant 0 : i32
    %c0_i32_0 = arith.constant 0 : i32
    return %arg0, %c0_i32 : i32, i32
  }
  func.func @transform_1(%arg0: i32) -> (i32, i32) {
    %c0_i32 = arith.constant 0 : i32
    %c0_i32_0 = arith.constant 0 : i32
    return %arg0, %c0_i32 : i32, i32
  }
  func.func @transform_2(%arg0: i32) -> (i32, i32) {
    %c0_i32 = arith.constant 0 : i32
    %c0_i32_0 = arith.constant 0 : i32
    %c0_i32_1 = arith.constant 0 : i32
    return %c0_i32, %c0_i32_0 : i32, i32
  }
  func.func @transform_3(%arg0: i32) -> (i32, i32) {
    %c0_i32 = arith.constant 0 : i32
    %c0_i32_0 = arith.constant 0 : i32
    %c0_i32_1 = arith.constant 0 : i32
    return %c0_i32, %c0_i32_0 : i32, i32
  }
  func.func @transform_4(%arg0: i32) -> (i32, i32) {
    %c0_i32 = arith.constant 0 : i32
    %c0_i32_0 = arith.constant 0 : i32
    %c0_i32_1 = arith.constant 0 : i32
    return %c0_i32, %c0_i32_0 : i32, i32
  }
  func.func @transform_5(%arg0: i32) -> (i32, i32) {
    %c0_i32 = arith.constant 0 : i32
    %c0_i32_0 = arith.constant 0 : i32
    return %arg0, %c0_i32 : i32, i32
  }
}

</mosaic_0001>

<bundles_post_ra>
// kernel: tpu_custom_call.1
= control target key start
LH: loop header
LB: loop body
LE: loop exit
PB: predicated region body
PF: predicated region fallthrough
CT: control target
= control target key end

     0   :  { %10 = vsyncpa [#allocation3], 0  ;;  %s1130_s0 = inlined_call_operand.vmem [shape: bf16[128,128], index: 0, kind: input, shape index: {}]   ;;  %s1131_s1 = inlined_call_operand.vmem [shape: s32[128,1], index: 1, kind: input, shape index: {}]   ;;  %s1132_s2 = inlined_call_operand.hbm [shape: bf16[32,128], index: 2, kind: input, shape index: {}]   ;;  %s1133_s3 = inlined_call_operand.vmem [shape: bf16[128,128], index: 3, kind: input, shape index: {}]   ;;  %s1134_s4 = inlined_call_operand.vmem [shape: f32[1,128], index: 4, kind: input, shape index: {}]   ;;  %s1135_s5 = inlined_call_operand.hbm [shape: bf16[128,128], index: 5, kind: output, shape index: {}]  }
   0x1   :  { %11 = vsyncpa [#allocation4], 0  ;;  %s915_s18 = smov [#allocation2]   ;;  %s867_s22 = scalar_lea.hbm %s1132_s2, 256 }
   0x2   :  { %s21_s19 = sshll.u32 %s915_s18, 4  ;;  %p868_p0 = scmp.ne.s32.totalorder %s1132_s2, %s867_s22  ;;  %s22_s19 = int_to_ptr.vmem [resolvable:$true] %s21_s19 }
   0x3   :  { %p871_p1 = scmp.lt.u32.totalorder %s867_s22, %s1132_s2 }
   0x5   :  { %p873_p2 = pnand %p871_p1, %p868_p0 }
   0x7   :  { %876 = shalt.err (!%p873_p2)
}
   0x8   :  { %s877_s27 = scalar_lea.vmem %s22_s19, 256  ;;  %p882_p4 = scmp.lt.s32.totalorder %s22_s19, %s22_s19 }
   0x9   :  { %p878_p3 = scmp.ne.s32.totalorder %s22_s19, %s877_s27  ;;  %p883_p5 = scmp.lt.s32.totalorder %s877_s27, %s877_s27 }
   0xb   :  { %p884_p6 = por %p883_p5, %p882_p4 }
   0xd   :  { %p885_p7 = pnand %p884_p6, %p878_p3 }
   0xf   :  { %888 = shalt.err (!%p885_p7)
}
  0x10   :  { %s916_s28 = smov 64   ;;  %s917_s29 = smov 4  }
  0x11   :  { %27 = dma.hbm_to_vmem [thread:$0]  %s1132_s2, 256, %s22_s19, [#allocation3], %s916_s28, %s916_s28, %s917_s29  }
  0x12   :  { %911 = dma.done.wait [#allocation3], 256  }
  0x13   :  { %912 = vsyncadd [#allocation3], 4294967040  ;;  %v918_v0 = vmov 0   ;;  %v272_v1 = vld [vmem:[%s1131_s1 + $0x10] sm:$0xff]  ;;  %v270_v2 = vld [vmem:[%s1131_s1] sm:$0xff]  ;;  %v268_v35 = vlaneseq  ;;  %vm390_vm4 = vcmask 261120  }
  0x14   :  { %848 = vset.pattern.permute.xlu1 %v918_v0  ;;  %847 = vset.pattern.permute.xlu0 %v918_v0  ;;  %v273_v3 = vld [vmem:[%s1131_s1 + $0x18] sm:$0xff]  ;;  %v271_v4 = vld [vmem:[%s1131_s1 + $0x8] sm:$0xff]  ;;  %v274_v6 = vld [vmem:[%s1131_s1 + $0x20] sm:$0xff]  ;;  %v919_v41 = vmov 0.0  }
  0x15   :  { %293 = vperm.xlu1 %848, %v272_v1   ;;  %287 = vperm.xlu0 %847, %v270_v2   ;;  %v275_v5 = vld [vmem:[%s1131_s1 + $0x28] sm:$0xff]  ;;  %v849_v7 = vld [vmem:[%s1133_s3] sm:$0xff]   ;;  %v277_v9 = vld [vmem:[%s1131_s1 + $0x38] sm:$0xff]  ;;  %v1062_v36 = vand.u32 127, %v268_v35 }
  0x16   :  { %v850_v8 = vld [vmem:[%s1133_s3 + $0x8] sm:$0xff]   ;;  %757 = vmatprep.subr.bf16.mxu1 %v849_v7  ;;  %v276_v10 = vld [vmem:[%s1131_s1 + $0x30] sm:$0xff]  ;;  %v278_v13 = vld [vmem:[%s1131_s1 + $0x40] sm:$0xff] }
  0x17   :  { %758 = vmatpush3.bf16.msra.mxu1 %v849_v7  ;;  %v851_v11 = vld [vmem:[%s1133_s3 + $0x10] sm:$0xff]   ;;  %v279_v12 = vld [vmem:[%s1131_s1 + $0x48] sm:$0xff]  ;;  %v852_v14 = vld [vmem:[%s1133_s3 + $0x18] sm:$0xff]  }
  0x18   :  { %759 = vmatprep.subr.bf16.mxu1 %v850_v8  ;;  %v857_v15 = vld [vmem:[#allocation2] sm:$0xff]   ;;  %v281_v17 = vld [vmem:[%s1131_s1 + $0x58] sm:$0xff]  ;;  %v860_v18 = vld [vmem:[#allocation2 + $0x8] sm:$0xff]  }
  0x19   :  { %296 = vperm.xlu1 %848, %v273_v3   ;;  %290 = vperm.xlu0 %847, %v271_v4   ;;  %v858_v16 = vld [vmem:[%s1130_s0] sm:$0xff]   ;;  %v280_v19 = vld [vmem:[%s1131_s1 + $0x50] sm:$0xff]  ;;  %v283_v21 = vld [vmem:[%s1131_s1 + $0x68] sm:$0xff] }
  0x1a   :  { %789 = vmatprep.subr.bf16.mxu0 %v857_v15  ;;  %v853_v20 = vld [vmem:[%s1133_s3 + $0x20] sm:$0xff]   ;;  %773 = vmatprep.mubr.bf16.mxu1 %v858_v16  ;;  %v854_v23 = vld [vmem:[%s1133_s3 + $0x28] sm:$0xff]   ;;  %v285_v24 = vld [vmem:[%s1131_s1 + $0x78] sm:$0xff] }
  0x1b   :  { %760 = vmatpush3.bf16.msra.mxu1 %v850_v8  ;;  %790 = vmatpush3.bf16.msra.mxu0 %v857_v15  ;;  %v282_v22 = vld [vmem:[%s1131_s1 + $0x60] sm:$0xff]  ;;  %v284_v25 = vld [vmem:[%s1131_s1 + $0x70] sm:$0xff]  ;;  %v856_v27 = vld [vmem:[%s1133_s3 + $0x38] sm:$0xff]  }
  0x1c   :  { %761 = vmatprep.subr.bf16.mxu1 %v851_v11  ;;  %791 = vmatprep.subr.bf16.mxu0 %v860_v18  ;;  %v855_v26 = vld [vmem:[%s1133_s3 + $0x30] sm:$0xff]   ;;  %v859_v28 = vld [vmem:[%s1130_s0 + $0x8] sm:$0xff]   ;;  %v862_v30 = vld [vmem:[%s1130_s0 + $0x18] sm:$0xff]  }
  0x1d   :  { %302 = vperm.xlu1 %848, %v275_v5   ;;  %299 = vperm.xlu0 %847, %v274_v6   ;;  %v861_v29 = vld [vmem:[%s1130_s0 + $0x10] sm:$0xff]   ;;  %v863_v31 = vld [vmem:[%s1130_s0 + $0x20] sm:$0xff]   ;;  %v864_v32 = vld [vmem:[%s1130_s0 + $0x28] sm:$0xff]  }
  0x1e   :  { %v865_v33 = vld [vmem:[%s1130_s0 + $0x30] sm:$0xff]   ;;  %v866_v34 = vld [vmem:[%s1130_s0 + $0x38] sm:$0xff]  }
  0x1f   :  { %762 = vmatpush3.bf16.msra.mxu1 %v851_v11  ;;  %792 = vmatpush3.bf16.msra.mxu0 %v860_v18 }
  0x20   :  { %763 = vmatprep.subr.bf16.mxu1 %v852_v14 }
  0x21   :  { %308 = vperm.xlu1 %848, %v277_v9   ;;  %305 = vperm.xlu0 %847, %v276_v10  }
  0x23   :  { %764 = vmatpush3.bf16.msra.mxu1 %v852_v14 }
  0x24   :  { %765 = vmatprep.subr.bf16.mxu1 %v853_v20 }
  0x25   :  { %314 = vperm.xlu1 %848, %v279_v12   ;;  %311 = vperm.xlu0 %847, %v278_v13  }
  0x27   :  { %766 = vmatpush3.bf16.msra.mxu1 %v853_v20 }
  0x28   :  { %767 = vmatprep.subr.bf16.mxu1 %v854_v23 }
  0x29   :  { %320 = vperm.xlu1 %848, %v281_v17   ;;  %317 = vperm.xlu0 %847, %v280_v19  }
  0x2b   :  { %768 = vmatpush3.bf16.msra.mxu1 %v854_v23 }
  0x2c   :  { %769 = vmatprep.subr.bf16.mxu1 %v855_v26 }
  0x2d   :  { %326 = vperm.xlu1 %848, %v283_v21   ;;  %323 = vperm.xlu0 %847, %v282_v22  }
  0x2f   :  { %770 = vmatpush3.bf16.msra.mxu1 %v855_v26 }
  0x30   :  { %771 = vmatprep.subr.bf16.mxu1 %v856_v27 }
  0x31   :  { %332 = vperm.xlu1 %848, %v285_v24   ;;  %329 = vperm.xlu0 %847, %v284_v25  }
  0x33   :  { %772 = vmatpush3.bf16.msra.mxu1 %v856_v27 }
  0x36   :  { %774 = vmatmul.mubr.bf16.vlgmr.msra.gmra.mrb[0].mxu1 %v859_v28 }
  0x37   :  { %777 = vmatprep.mubr.bf16.mxu1 %v861_v29 }
  0x3e   :  { %778 = vmatmul.mubr.bf16.gmra.mrb[4].mxu1 %v862_v30  ;;  %v1095_v30 = vld [vmem:[%s1134_s4] ss:$0 sm:$0xff]  ;;  %s920_s4 = smov [#allocation5]  }
  0x3f   :  { %781 = vmatprep.mubr.bf16.mxu1 %v863_v31  ;;  %s613_s21 = sshll.u32 %s920_s4, 4  ;;  %s614_s21 = int_to_ptr.vmem [resolvable:$true] %s613_s21 }
  0x40   :  { %s889_s22 = scalar_lea.vmem %s614_s21, 1024  ;;  %p894_p9 = scmp.lt.s32.totalorder %s614_s21, %s614_s21 }
  0x41   :  { %p890_p8 = scmp.ne.s32.totalorder %s614_s21, %s889_s22  ;;  %p895_p10 = scmp.lt.s32.totalorder %s889_s22, %s889_s22 }
  0x43   :  { %p896_p11 = por %p895_p10, %p894_p9 }
  0x45   :  { %p897_p12 = pnand %p896_p11, %p890_p8 }
  0x46   :  { %782 = vmatmul.mubr.bf16.gmra.mrb[8].mxu1 %v864_v32 }
  0x47   :  { %785 = vmatprep.mubr.bf16.mxu1 %v865_v33 }
  0x4e   :  { %786 = vmatmul.mubr.bf16.gmra.mrb[12].mxu1 %v866_v34 }
  0x94   :  { %v294_v37 = vpop.permute.xlu1 %293  ;;  %v288_v38 = vpop.permute.xlu0 %287 }
  0x95   :  { %vm336_vm0 = vcmp.eq.s32.totalorder %v294_v37, %v1062_v36  ;;  %vm334_vm1 = vcmp.eq.s32.totalorder %v288_v38, %v1062_v36 }
  0x96   :  { %v352_v42 = vsel %vm336_vm0, 1.0, %v919_v41  ;;  %v350_v43 = vsel %vm334_vm1, 1.0, %v919_v41 }
  0x98   :  { %v297_v39 = vpop.permute.xlu1 %296  ;;  %v291_v40 = vpop.permute.xlu0 %290 }
  0x99   :  { %vm337_vm2 = vcmp.eq.s32.totalorder %v297_v39, %v1062_v36  ;;  %vm335_vm3 = vcmp.eq.s32.totalorder %v291_v40, %v1062_v36 }
  0x9a   :  { %v353_v44 = vsel %vm337_vm2, 1.0, %v919_v41  ;;  %v351_v45 = vsel %vm335_vm3, 1.0, %v919_v41 }
  0x9b   :  { %v367_v46 = vpack.c.bf16 %v353_v44, %v352_v42  ;;  %v366_v47 = vpack.c.bf16 %v351_v45, %v350_v43 }
  0x9c   :  { %v303_v48 = vpop.permute.xlu1 %302  ;;  %v300_v49 = vpop.permute.xlu0 %299 }
  0x9d   :  { %vm339_vm5 = vcmp.eq.s32.totalorder %v303_v48, %v1062_v36  ;;  %vm338_vm6 = vcmp.eq.s32.totalorder %v300_v49, %v1062_v36  ;;  %793 = vmatprep.mubr.msk.bf16.mxu0 %vm390_vm4, %v366_v47 }
  0x9e   :  { %v355_v50 = vsel %vm339_vm5, 1.0, %v919_v41  ;;  %v354_v51 = vsel %vm338_vm6, 1.0, %v919_v41  ;;  %794 = vmatmul.mubr.msk.bf16.vlgmr.msra.gmra.mrb[0].mxu0 %vm390_vm4, %v367_v46 }
  0x9f   :  { %v368_v52 = vpack.c.bf16 %v355_v50, %v354_v51 }
  0xa0   :  { %v309_v53 = vpop.permute.xlu1 %308  ;;  %v306_v54 = vpop.permute.xlu0 %305 }
  0xa1   :  { %vm341_vm7 = vcmp.eq.s32.totalorder %v309_v53, %v1062_v36  ;;  %vm340_vm8 = vcmp.eq.s32.totalorder %v306_v54, %v1062_v36  ;;  %797 = vmatprep.mubr.msk.bf16.mxu0 %vm390_vm4, %v368_v52 }
  0xa2   :  { %v357_v55 = vsel %vm341_vm7, 1.0, %v919_v41  ;;  %v356_v56 = vsel %vm340_vm8, 1.0, %v919_v41 }
  0xa3   :  { %v369_v57 = vpack.c.bf16 %v357_v55, %v356_v56 }
  0xa4   :  { %v315_v58 = vpop.permute.xlu1 %314  ;;  %v312_v59 = vpop.permute.xlu0 %311 }
  0xa5   :  { %vm343_vm9 = vcmp.eq.s32.totalorder %v315_v58, %v1062_v36  ;;  %vm342_vm10 = vcmp.eq.s32.totalorder %v312_v59, %v1062_v36 }
  0xa6   :  { %v359_v60 = vsel %vm343_vm9, 1.0, %v919_v41  ;;  %v358_v61 = vsel %vm342_vm10, 1.0, %v919_v41  ;;  %798 = vmatmul.mubr.msk.bf16.gmra.mrb[4].mxu0 %vm390_vm4, %v369_v57 }
  0xa7   :  { %v370_v62 = vpack.c.bf16 %v359_v60, %v358_v61 }
  0xa8   :  { %v321_v63 = vpop.permute.xlu1 %320  ;;  %v318_v0 = vpop.permute.xlu0 %317 }
  0xa9   :  { %vm345_vm11 = vcmp.eq.s32.totalorder %v321_v63, %v1062_v36  ;;  %vm344_vm12 = vcmp.eq.s32.totalorder %v318_v0, %v1062_v36  ;;  %801 = vmatprep.mubr.msk.bf16.mxu0 %vm390_vm4, %v370_v62 }
  0xaa   :  { %v361_v1 = vsel %vm345_vm11, 1.0, %v919_v41  ;;  %v360_v2 = vsel %vm344_vm12, 1.0, %v919_v41 }
  0xab   :  { %v371_v3 = vpack.c.bf16 %v361_v1, %v360_v2 }
  0xac   :  { %v327_v4 = vpop.permute.xlu1 %326  ;;  %v324_v5 = vpop.permute.xlu0 %323 }
  0xad   :  { %vm347_vm13 = vcmp.eq.s32.totalorder %v327_v4, %v1062_v36  ;;  %vm346_vm14 = vcmp.eq.s32.totalorder %v324_v5, %v1062_v36 }
  0xae   :  { %v363_v6 = vsel %vm347_vm13, 1.0, %v919_v41  ;;  %v362_v7 = vsel %vm346_vm14, 1.0, %v919_v41  ;;  %802 = vmatmul.mubr.msk.bf16.gmra.mrb[8].mxu0 %vm390_vm4, %v371_v3 }
  0xaf   :  { %v372_v8 = vpack.c.bf16 %v363_v6, %v362_v7 }
  0xb0   :  { %v333_v9 = vpop.permute.xlu1 %332  ;;  %v330_v10 = vpop.permute.xlu0 %329 }
  0xb1   :  { %vm349_vm15 = vcmp.eq.s32.totalorder %v333_v9, %v1062_v36  ;;  %vm348_vm0 = vcmp.eq.s32.totalorder %v330_v10, %v1062_v36  ;;  %805 = vmatprep.mubr.msk.bf16.mxu0 %vm390_vm4, %v372_v8 }
  0xb2   :  { %v365_v11 = vsel %vm349_vm15, 1.0, %v919_v41  ;;  %v364_v12 = vsel %vm348_vm0, 1.0, %v919_v41 }
  0xb3   :  { %v373_v13 = vpack.c.bf16 %v365_v11, %v364_v12 }
  0xb6   :  { %806 = vmatmul.mubr.msk.bf16.gmra.mrb[12].mxu0 %vm390_vm4, %v373_v13 }
 0x109   :  { %v775_v14 = vpop.f32.mrb[0].mxu1 }
 0x10a   :  { %v205_v15 = vpop.f32.mrb[1].mxu1  ;;  %v214_v31 = vadd.f32 %v775_v14, %v1095_v30 }
 0x10b   :  { %v776_v16 = vpop.f32.mrb[2].mxu1  ;;  %v206_v32 = vadd.f32 %v1095_v30, %v205_v15 }
 0x10c   :  { %v208_v17 = vpop.f32.mrb[3].mxu1  ;;  %v217_v34 = vadd.f32 %v776_v16, %v1095_v30 }
 0x10d   :  { %v209_v37 = vadd.f32 %v1095_v30, %v208_v17 }
 0x111   :  { %v779_v18 = vpop.f32.mrb[4].mxu1 }
 0x112   :  { %v221_v19 = vpop.f32.mrb[5].mxu1  ;;  %v230_v45 = vadd.f32 %v779_v18, %v1095_v30 }
 0x113   :  { %v780_v20 = vpop.f32.mrb[6].mxu1  ;;  %v222_v48 = vadd.f32 %v1095_v30, %v221_v19 }
 0x114   :  { %v224_v21 = vpop.f32.mrb[7].mxu1  ;;  %v233_v52 = vadd.f32 %v780_v20, %v1095_v30 }
 0x115   :  { %v225_v55 = vadd.f32 %v1095_v30, %v224_v21 }
 0x119   :  { %v783_v22 = vpop.f32.mrb[8].mxu1 }
 0x11a   :  { %v237_v23 = vpop.f32.mrb[9].mxu1  ;;  %v246_v63 = vadd.f32 %v783_v22, %v1095_v30 }
 0x11b   :  { %v784_v24 = vpop.f32.mrb[10].mxu1  ;;  %v238_v2 = vadd.f32 %v1095_v30, %v237_v23 }
 0x11c   :  { %v240_v25 = vpop.f32.mrb[11].mxu1  ;;  %v249_v6 = vadd.f32 %v784_v24, %v1095_v30 }
 0x11d   :  { %v241_v9 = vadd.f32 %v1095_v30, %v240_v25 }
 0x121   :  { %v787_v26 = vpop.f32.mrb[12].mxu1 }
 0x122   :  { %v253_v27 = vpop.f32.mrb[13].mxu1  ;;  %v262_v17 = vadd.f32 %v787_v26, %v1095_v30 }
 0x123   :  { %v1088_v28 = vpop.f32.mrb[14].mxu1  ;;  %v254_v20 = vadd.f32 %v1095_v30, %v253_v27 }
 0x124   :  { %v1090_v29 = vpop.f32.mrb[15].mxu1  ;;  %v265_v24 = vadd.f32 %v1088_v28, %v1095_v30 }
 0x171   :  { %v795_v33 = vpop.f32.mrb[0].mxu0 }
 0x172   :  { %v458_v35 = vadd.f32 %v795_v33, %v214_v31  ;;  %v449_v36 = vpop.f32.mrb[1].mxu0 }
 0x173   :  { %v450_v38 = vadd.f32 %v449_v36, %v206_v32  ;;  %v796_v39 = vpop.f32.mrb[2].mxu0  ;;  %v257_v32 = vadd.f32 %v1095_v30, %v1090_v29 }
 0x174   :  { %v461_v40 = vadd.f32 %v796_v39, %v217_v34  ;;  %v452_v41 = vpop.f32.mrb[3].mxu0  ;;  %v514_v43 = vmax.f32 %v458_v35, 0.0 }
 0x175   :  { %v453_v42 = vadd.f32 %v452_v41, %v209_v37  ;;  %v512_v46 = vmax.f32 %v450_v38, 0.0 }
 0x176   :  { %v515_v44 = vmax.f32 %v461_v40, 0.0 }
 0x177   :  { %v513_v47 = vmax.f32 %v453_v42, 0.0 }
 0x178   :  { %v692_v49 = vpack.c.bf16 %v515_v44, %v514_v43 }
 0x179   :  { %v687_v50 = vpack.c.bf16 %v513_v47, %v512_v46  ;;  %v799_v51 = vpop.f32.mrb[4].mxu0 }
 0x17a   :  { %724 = vst [vmem:[#allocation5 + $0x8] sm:$0xff] %v692_v49   ;;  %v474_v53 = vadd.f32 %v799_v51, %v230_v45  ;;  %v465_v54 = vpop.f32.mrb[5].mxu0 }
 0x17b   :  { %688 = vst [vmem:[#allocation5] sm:$0xff] %v687_v50   ;;  %v466_v56 = vadd.f32 %v465_v54, %v222_v48  ;;  %v800_v57 = vpop.f32.mrb[6].mxu0 }
 0x17c   :  { %v477_v58 = vadd.f32 %v800_v57, %v233_v52  ;;  %v468_v59 = vpop.f32.mrb[7].mxu0  ;;  %v518_v61 = vmax.f32 %v474_v53, 0.0 }
 0x17d   :  { %v469_v60 = vadd.f32 %v468_v59, %v225_v55  ;;  %v516_v0 = vmax.f32 %v466_v56, 0.0 }
 0x17e   :  { %v519_v62 = vmax.f32 %v477_v58, 0.0 }
 0x17f   :  { %v517_v1 = vmax.f32 %v469_v60, 0.0 }
 0x180   :  { %v702_v3 = vpack.c.bf16 %v519_v62, %v518_v61 }
 0x181   :  { %v697_v4 = vpack.c.bf16 %v517_v1, %v516_v0  ;;  %v803_v5 = vpop.f32.mrb[8].mxu0 }
 0x182   :  { %726 = vst [vmem:[#allocation5 + $0x18] sm:$0xff] %v702_v3   ;;  %v490_v7 = vadd.f32 %v803_v5, %v246_v63  ;;  %v481_v8 = vpop.f32.mrb[9].mxu0 }
 0x183   :  { %725 = vst [vmem:[#allocation5 + $0x10] sm:$0xff] %v697_v4   ;;  %v482_v10 = vadd.f32 %v481_v8, %v238_v2  ;;  %v804_v11 = vpop.f32.mrb[10].mxu0 }
 0x184   :  { %v493_v12 = vadd.f32 %v804_v11, %v249_v6  ;;  %v484_v13 = vpop.f32.mrb[11].mxu0  ;;  %v522_v15 = vmax.f32 %v490_v7, 0.0 }
 0x185   :  { %v485_v14 = vadd.f32 %v484_v13, %v241_v9  ;;  %v520_v18 = vmax.f32 %v482_v10, 0.0 }
 0x186   :  { %v523_v16 = vmax.f32 %v493_v12, 0.0 }
 0x187   :  { %v521_v19 = vmax.f32 %v485_v14, 0.0 }
 0x188   :  { %v712_v21 = vpack.c.bf16 %v523_v16, %v522_v15 }
 0x189   :  { %v707_v22 = vpack.c.bf16 %v521_v19, %v520_v18  ;;  %v807_v23 = vpop.f32.mrb[12].mxu0 }
 0x18a   :  { %728 = vst [vmem:[#allocation5 + $0x28] sm:$0xff] %v712_v21   ;;  %v506_v25 = vadd.f32 %v807_v23, %v262_v17  ;;  %v497_v31 = vpop.f32.mrb[13].mxu0 }
 0x18b   :  { %727 = vst [vmem:[#allocation5 + $0x20] sm:$0xff] %v707_v22   ;;  %v498_v33 = vadd.f32 %v497_v31, %v254_v20  ;;  %v808_v34 = vpop.f32.mrb[14].mxu0 }
 0x18c   :  { %v509_v26 = vadd.f32 %v808_v34, %v265_v24  ;;  %v500_v35 = vpop.f32.mrb[15].mxu0  ;;  %v526_v37 = vmax.f32 %v506_v25, 0.0 }
 0x18d   :  { %v501_v36 = vadd.f32 %v500_v35, %v257_v32  ;;  %v524_v38 = vmax.f32 %v498_v33, 0.0 }
 0x18e   :  { %v527_v27 = vmax.f32 %v509_v26, 0.0 }
 0x18f   :  { %v525_v39 = vmax.f32 %v501_v36, 0.0 }
 0x190   :  { %v722_v40 = vpack.c.bf16 %v527_v27, %v526_v37 }
 0x191   :  { %v717_v41 = vpack.c.bf16 %v525_v39, %v524_v38 }
 0x192   :  { %730 = vst [vmem:[#allocation5 + $0x38] sm:$0xff] %v722_v40  }
 0x193   :  { %729 = vst [vmem:[#allocation5 + $0x30] sm:$0xff] %v717_v41  }
 0x194   :  { %900 = shalt.err (!%p897_p12)
}
 0x195   :  { %s901_s25 = scalar_lea.hbm %s1135_s5, 1024 }
 0x196   :  { %p902_p13 = scmp.ne.s32.totalorder %s1135_s5, %s901_s25  ;;  %p905_p0 = scmp.lt.u32.totalorder %s901_s25, %s1135_s5 }
 0x198   :  { %p907_p1 = pnand %p905_p0, %p902_p13 }
 0x19a   :  { %910 = shalt.err (!%p907_p1)
}
 0x19b   :  { %619 = dma.vmem_to_hbm [thread:$0]  %s614_s21, 1024, %s1135_s5, [#allocation4], %s916_s28, %s916_s28, %s917_s29  }
 0x19c   :  { %913 = dma.done.wait [#allocation4], 1024  }
 0x19d   :  { %914 = vsyncadd [#allocation4], 4294966272 }
 0x19e   :  { %623 = vsyncpa [#allocation3], 1 }
 0x19f   :  { %624 = vsyncpa [#allocation4], 1 }

</bundles_post_ra>
